<compile_context>
chip_gen: v7x
topology: tpu7x:2x2x1
jax: 0.10.0
libtpu: 0.0.40
codegen_flags: <defaults>
</compile_context>

<pallas_src>
import functools
import math

import jax
import jax.numpy as jnp
from jax import lax
from jax.experimental import pallas as pl
from jax.experimental.pallas import tpu as pltpu


# ----------------------------- kernel helpers -----------------------------

def _mm(a, b, dtype):
    """a @ b with operands cast to `dtype`, f32 accumulation on the MXU."""
    return jnp.dot(a.astype(dtype), b.astype(dtype),
                   preferred_element_type=jnp.float32)


def _layernorm(x, g_ref, b_ref, eps=1e-5):
    mu = jnp.mean(x, axis=-1, keepdims=True)
    var = jnp.mean((x - mu) ** 2, axis=-1, keepdims=True)
    return (x - mu) * lax.rsqrt(var + eps) * g_ref[...] + b_ref[...]


# ------------------------------ fused kernel ------------------------------

def encoder_layer_kernel(
    src_ref, pos_ref,
    wqk_ref, bqk_ref,        # fused Q/K projection (D, 2D) / (1, 2D); scale folded into Q
    wv_ref, bv_ref,          # V projection (D, D) / (1, D)
    wo_ref, bo_ref,          # output projection (D, D) / (1, D), (in, out) layout
    g1_ref, be1_ref,         # LayerNorm1
    w1_ref, b1_ref,          # FFN linear1 (D, F) / (1, F)
    w2_ref, b2_ref,          # FFN linear2 (F, D) / (1, D)
    g2_ref, be2_ref,         # LayerNorm2
    out_ref,
    *, nhead, matmul_dtype,
):
    x = src_ref[0]      # (S, D)
    p = pos_ref[0]      # (S, D)
    S, D = x.shape
    hd = D // nhead
    dt = matmul_dtype

    # --- self attention: q, k get the positional embedding, v does not ---
    xp = x + p
    qk = _mm(xp, wqk_ref[...], dt) + bqk_ref[...]    # (S, 2D) fused Q/K projection
    v = _mm(x, wv_ref[...], dt) + bv_ref[...]        # (S, D)
    q = qk[:, :D]       # 1/sqrt(hd) already folded into wqk/bqk
    k = qk[:, D:]

    # Per-head attention with the output projection fused into the head loop:
    # each head accumulates a lane-dense (S, D) contribution and only one
    # (S, S) score matrix is live at a time (no concatenate, bounded liveness).
    acc = jnp.zeros((S, D), jnp.float32)
    for h in range(nhead):                           # static head loop
        lo = h * hd
        qh = q[:, lo:lo + hd]
        kh = k[:, lo:lo + hd]
        vh = v[:, lo:lo + hd]
        s = lax.dot_general(
            qh.astype(dt), kh.astype(dt), (((1,), (1,)), ((), ())),
            preferred_element_type=jnp.float32)      # (S, S)
        s = s - jnp.max(s, axis=-1, keepdims=True)
        e = jnp.exp(s)
        # EUP approx reciprocal instead of a VALU divide over the SxS matrix.
        a = e * pl.reciprocal(jnp.sum(e, axis=-1, keepdims=True), approx=True)
        oh = _mm(a, vh, dt)                          # (S, hd)
        acc = acc + _mm(oh, wo_ref[lo:lo + hd, :], dt)   # fused out-proj, (S, D)
    attn = acc + bo_ref[...]

    # --- residual + norm1 (f32) ---
    x1 = _layernorm(x + attn, g1_ref, be1_ref)

    # --- feed forward ---
    h1 = jnp.maximum(_mm(x1, w1_ref[...], dt) + b1_ref[...], 0.0)
    h2 = _mm(h1, w2_ref[...], dt) + b2_ref[...]

    # --- residual + norm2 ---
    out_ref[0] = _layernorm(x1 + h2, g2_ref, be2_ref)


# ------------------------- host-side weight packing -------------------------

def pack_layer_params(lp, nhead):
    """PyTorch-layout params -> kernel layout: (in, out) weights, fused Q/K,
    softmax scale folded into the Q weights/bias."""
    D = lp["wq"].shape[0]
    hd = D // nhead
    scale = 1.0 / math.sqrt(hd)
    return dict(
        wqk=jnp.concatenate([lp["wq"].T * scale, lp["wk"].T], axis=1),   # (D, 2D)
        bqk=jnp.concatenate([lp["bq"] * scale, lp["bk"]], axis=1),       # (1, 2D)
        wv=lp["wv"].T, bv=lp["bv"],
        wo=lp["wo"].T, bo=lp["bo"],
        g1=lp["g1"], be1=lp["be1"],
        w1=lp["w1"].T, b1=lp["b1"],
        w2=lp["w2"].T, b2=lp["b2"],
        g2=lp["g2"], be2=lp["be2"],
    )


# ------------------------------ wrappers -----------------------------------

def encoder_layer_pallas(x_bsd, pos_bsd, pk, nhead, matmul_dtype):
    B, S, D = x_bsd.shape
    Fdim = pk["w1"].shape[1]

    def _full(shape):
        nd = len(shape)
        return pl.BlockSpec(shape, lambda b, _nd=nd: (0,) * _nd)

    bspec = pl.BlockSpec((1, S, D), lambda b: (b, 0, 0))
    in_specs = [
        bspec, bspec,
        _full((D, 2 * D)), _full((1, 2 * D)),
        _full((D, D)), _full((1, D)),
        _full((D, D)), _full((1, D)),
        _full((1, D)), _full((1, D)),
        _full((D, Fdim)), _full((1, Fdim)),
        _full((Fdim, D)), _full((1, D)),
        _full((1, D)), _full((1, D)),
    ]
    return pl.pallas_call(
        functools.partial(encoder_layer_kernel, nhead=nhead,
                          matmul_dtype=matmul_dtype),
        out_shape=jax.ShapeDtypeStruct((B, S, D), jnp.float32),
        grid=(B,),
        in_specs=in_specs,
        out_specs=bspec,
        input_output_aliases={0: 0},   # reuse the activation buffer across layers
        compiler_params=pltpu.CompilerParams(dimension_semantics=("parallel",)),
    )(
        x_bsd, pos_bsd,
        pk["wqk"], pk["bqk"], pk["wv"], pk["bv"],
        pk["wo"], pk["bo"],
        pk["g1"], pk["be1"],
        pk["w1"], pk["b1"], pk["w2"], pk["b2"],
        pk["g2"], pk["be2"],
    )


@functools.partial(jax.jit, static_argnames=("nhead", "matmul_dtype"))
def transformer_encoder_pallas(src_sbd, pos_sbd, layer_params, nhead,
                               matmul_dtype=jnp.float32):
    """TransformerEncoder.forward with mask=None, key_padding_mask=None, norm=None."""
    x = jnp.transpose(src_sbd, (1, 0, 2))    # (S,B,D) -> (B,S,D)
    p = jnp.transpose(pos_sbd, (1, 0, 2))
    for lp in layer_params:                  # stacked (deep-copied) layers
        pk = pack_layer_params(lp, nhead)    # host-side, fused by XLA
        x = encoder_layer_pallas(x, p, pk, nhead, matmul_dtype)
    return jnp.transpose(x, (1, 0, 2))       # back to (S,B,D)


# --------------------------- parameter creation -----------------------------

def init_layer_params(key, d_model, dim_ff):
    ks = jax.random.split(key, 8)
    nrm = lambda k, shape, s=0.05: jax.random.normal(k, shape, jnp.float32) * s
    in_proj_w = nrm(ks[0], (3 * d_model, d_model))
    in_proj_b = nrm(ks[1], (3 * d_model,), 0.01)
    r = lambda v: v.reshape(1, -1)
    return dict(
        wq=in_proj_w[:d_model], wk=in_proj_w[d_model:2 * d_model],
        wv=in_proj_w[2 * d_model:],
        bq=r(in_proj_b[:d_model]), bk=r(in_proj_b[d_model:2 * d_model]),
        bv=r(in_proj_b[2 * d_model:]),
        wo=nrm(ks[2], (d_model, d_model)), bo=r(nrm(ks[3], (d_model,), 0.01)),
        g1=jnp.ones((1, d_model), jnp.float32),
        be1=jnp.zeros((1, d_model), jnp.float32),
        w1=nrm(ks[4], (dim_ff, d_model)), b1=r(nrm(ks[5], (dim_ff,), 0.01)),
        w2=nrm(ks[6], (d_model, dim_ff)), b2=r(nrm(ks[7], (d_model,), 0.01)),
        g2=jnp.ones((1, d_model), jnp.float32),
        be2=jnp.zeros((1, d_model), jnp.float32),
    )


# ------------------------------ pure-JAX reference ---------------------------

def encoder_layer_ref(x, p, lp, nhead):
    B, S, D = x.shape
    hd = D // nhead
    lin = lambda a, w, b: jnp.einsum("bsd,od->bso", a, w) + b[0]
    q = lin(x + p, lp["wq"], lp["bq"])
    k = lin(x + p, lp["wk"], lp["bk"])
    v = lin(x, lp["wv"], lp["bv"])
    qh = q.reshape(B, S, nhead, hd)
    kh = k.reshape(B, S, nhead, hd)
    vh = v.reshape(B, S, nhead, hd)
    s = jnp.einsum("bqhd,bkhd->bhqk", qh, kh) / math.sqrt(hd)
    a = jax.nn.softmax(s, axis=-1)
    o = jnp.einsum("bhqk,bkhd->bqhd", a, vh).reshape(B, S, D)
    o = lin(o, lp["wo"], lp["bo"])

    def ln(y, g, b):
        mu = y.mean(-1, keepdims=True)
        var = ((y - mu) ** 2).mean(-1, keepdims=True)
        return (y - mu) / jnp.sqrt(var + 1e-5) * g[0] + b[0]

    x1 = ln(x + o, lp["g1"], lp["be1"])
    h1 = jax.nn.relu(lin(x1, lp["w1"], lp["b1"]))
    h2 = lin(h1, lp["w2"], lp["b2"])
    return ln(x1 + h2, lp["g2"], lp["be2"])


def transformer_encoder_ref(src_sbd, pos_sbd, layer_params, nhead):
    x = jnp.transpose(src_sbd, (1, 0, 2))
    p = jnp.transpose(pos_sbd, (1, 0, 2))
    for lp in layer_params:
        x = encoder_layer_ref(x, p, lp, nhead)
    return jnp.transpose(x, (1, 0, 2))


# ---------------------------------- main ------------------------------------

if __name__ == "__main__":
    S, B, D = 8, 2, 32          # seq, batch, d_model
    NHEAD, FF, NUM_LAYERS = 4, 64, 2

    key = jax.random.PRNGKey(0)
    k_src, k_pos, k_params = jax.random.split(key, 3)
    src = jax.random.normal(k_src, (S, B, D), jnp.float32)   # (seq, batch, d_model)
    pos = jax.random.normal(k_pos, (S, B, D), jnp.float32)

    layer_keys = jax.random.split(k_params, NUM_LAYERS)
    layer_params = [init_layer_params(k, D, FF) for k in layer_keys]

    # f32 matmuls for the correctness check; pass matmul_dtype=jnp.bfloat16 on
    # v6e/v7x for 2x MXU throughput (accumulation stays f32).
    out = transformer_encoder_pallas(src, pos, layer_params, nhead=NHEAD)
    out = jax.block_until_ready(out)

    ref = jax.block_until_ready(
        transformer_encoder_ref(src, pos, layer_params, NHEAD))

    assert out.shape == (S, B, D), out.shape
    max_err = float(jnp.max(jnp.abs(out - ref)))
    # tolerance accounts for the EUP approximate reciprocal in the softmax
    assert max_err < 1e-2, max_err

    print("KERNEL_OK")
</pallas_src>

<mosaic_0001>
module attributes {stable_mosaic.version = 11 : i64} {
  func.func @encoder_layer_kernel(%arg0: i32, %arg1: memref<1x8x32xf32, #tpu.memory_space<vmem>>, %arg2: memref<1x8x32xf32, #tpu.memory_space<vmem>>, %arg3: memref<32x64xf32, #tpu.memory_space<vmem>>, %arg4: memref<1x64xf32, #tpu.memory_space<vmem>>, %arg5: memref<32x32xf32, #tpu.memory_space<vmem>>, %arg6: memref<1x32xf32, #tpu.memory_space<vmem>>, %arg7: memref<32x32xf32, #tpu.memory_space<vmem>>, %arg8: memref<1x32xf32, #tpu.memory_space<vmem>>, %arg9: memref<1x32xf32, #tpu.memory_space<vmem>>, %arg10: memref<1x32xf32, #tpu.memory_space<vmem>>, %arg11: memref<32x64xf32, #tpu.memory_space<vmem>>, %arg12: memref<1x64xf32, #tpu.memory_space<vmem>>, %arg13: memref<64x32xf32, #tpu.memory_space<vmem>>, %arg14: memref<1x32xf32, #tpu.memory_space<vmem>>, %arg15: memref<1x32xf32, #tpu.memory_space<vmem>>, %arg16: memref<1x32xf32, #tpu.memory_space<vmem>>, %arg17: memref<1x8x32xf32, #tpu.memory_space<vmem>>) attributes {dimension_semantics = [#tpu.dimension_semantics<parallel>], iteration_bounds = array<i64: 2>, scalar_prefetch = 0 : i64, scratch_operands = 0 : i64, tpu.core_type = #tpu.core_type<tc>, window_params = [{transform_indices = @transform_0, window_bounds = array<i64: 1, 8, 32>}, {transform_indices = @transform_1, window_bounds = array<i64: 1, 8, 32>}, {pipeline_mode = #tpu.pipeline_mode<synchronous>, transform_indices = @transform_2, window_bounds = array<i64: 32, 64>}, {pipeline_mode = #tpu.pipeline_mode<synchronous>, transform_indices = @transform_3, window_bounds = array<i64: 1, 64>}, {pipeline_mode = #tpu.pipeline_mode<synchronous>, transform_indices = @transform_4, window_bounds = array<i64: 32, 32>}, {pipeline_mode = #tpu.pipeline_mode<synchronous>, transform_indices = @transform_5, window_bounds = array<i64: 1, 32>}, {pipeline_mode = #tpu.pipeline_mode<synchronous>, transform_indices = @transform_6, window_bounds = array<i64: 32, 32>}, {pipeline_mode = #tpu.pipeline_mode<synchronous>, transform_indices = @transform_7, window_bounds = array<i64: 1, 32>}, {pipeline_mode = #tpu.pipeline_mode<synchronous>, transform_indices = @transform_8, window_bounds = array<i64: 1, 32>}, {pipeline_mode = #tpu.pipeline_mode<synchronous>, transform_indices = @transform_9, window_bounds = array<i64: 1, 32>}, {pipeline_mode = #tpu.pipeline_mode<synchronous>, transform_indices = @transform_10, window_bounds = array<i64: 32, 64>}, {pipeline_mode = #tpu.pipeline_mode<synchronous>, transform_indices = @transform_11, window_bounds = array<i64: 1, 64>}, {pipeline_mode = #tpu.pipeline_mode<synchronous>, transform_indices = @transform_12, window_bounds = array<i64: 64, 32>}, {pipeline_mode = #tpu.pipeline_mode<synchronous>, transform_indices = @transform_13, window_bounds = array<i64: 1, 32>}, {pipeline_mode = #tpu.pipeline_mode<synchronous>, transform_indices = @transform_14, window_bounds = array<i64: 1, 32>}, {pipeline_mode = #tpu.pipeline_mode<synchronous>, transform_indices = @transform_15, window_bounds = array<i64: 1, 32>}, {transform_indices = @transform_16, window_bounds = array<i64: 1, 8, 32>}]} {
    %c0 = arith.constant 0 : index
    %c0_0 = arith.constant 0 : index
    %c0_1 = arith.constant 0 : index
    %0 = vector.load %arg1[%c0, %c0_0, %c0_1] : memref<1x8x32xf32, #tpu.memory_space<vmem>>, vector<1x8x32xf32>
    %1 = vector.shape_cast %0 : vector<1x8x32xf32> to vector<8x32xf32>
    %c0_2 = arith.constant 0 : index
    %c0_3 = arith.constant 0 : index
    %c0_4 = arith.constant 0 : index
    %2 = vector.load %arg2[%c0_2, %c0_3, %c0_4] : memref<1x8x32xf32, #tpu.memory_space<vmem>>, vector<1x8x32xf32>
    %3 = vector.shape_cast %2 : vector<1x8x32xf32> to vector<8x32xf32>
    %4 = arith.addf %1, %3 : vector<8x32xf32>
    %c0_5 = arith.constant 0 : index
    %c0_6 = arith.constant 0 : index
    %5 = vector.load %arg3[%c0_5, %c0_6] : memref<32x64xf32, #tpu.memory_space<vmem>>, vector<32x64xf32>
    %cst = arith.constant dense<0.000000e+00> : vector<8x64xf32>
    %6 = tpu.matmul %4, %5, %cst {dimension_numbers = #tpu.dot_dimension_numbers<[1], [0], [0], [1], [0, 0, 1, 1], [], []>} : vector<8x32xf32>, vector<32x64xf32>, vector<8x64xf32> -> vector<8x64xf32>
    %c0_7 = arith.constant 0 : index
    %c0_8 = arith.constant 0 : index
    %7 = vector.load %arg4[%c0_7, %c0_8] : memref<1x64xf32, #tpu.memory_space<vmem>>, vector<1x64xf32>
    %8 = vector.broadcast %7 : vector<1x64xf32> to vector<8x64xf32>
    %9 = arith.addf %6, %8 : vector<8x64xf32>
    %c0_9 = arith.constant 0 : index
    %c0_10 = arith.constant 0 : index
    %10 = vector.load %arg5[%c0_9, %c0_10] : memref<32x32xf32, #tpu.memory_space<vmem>>, vector<32x32xf32>
    %cst_11 = arith.constant dense<0.000000e+00> : vector<8x32xf32>
    %11 = tpu.matmul %1, %10, %cst_11 {dimension_numbers = #tpu.dot_dimension_numbers<[1], [0], [0], [1], [0, 0, 1, 1], [], []>} : vector<8x32xf32>, vector<32x32xf32>, vector<8x32xf32> -> vector<8x32xf32>
    %c0_12 = arith.constant 0 : index
    %c0_13 = arith.constant 0 : index
    %12 = vector.load %arg6[%c0_12, %c0_13] : memref<1x32xf32, #tpu.memory_space<vmem>>, vector<1x32xf32>
    %13 = vector.broadcast %12 : vector<1x32xf32> to vector<8x32xf32>
    %14 = arith.addf %11, %13 : vector<8x32xf32>
    %15 = vector.extract_strided_slice %9 {offsets = [0, 0], sizes = [8, 32], strides = [1, 1]} : vector<8x64xf32> to vector<8x32xf32>
    %16 = vector.extract_strided_slice %9 {offsets = [0, 32], sizes = [8, 32], strides = [1, 1]} : vector<8x64xf32> to vector<8x32xf32>
    %cst_14 = arith.constant 0.000000e+00 : f32
    %17 = vector.broadcast %cst_14 : f32 to vector<8x32xf32>
    %18 = vector.extract_strided_slice %15 {offsets = [0, 0], sizes = [8, 8], strides = [1, 1]} : vector<8x32xf32> to vector<8x8xf32>
    %19 = vector.extract_strided_slice %16 {offsets = [0, 0], sizes = [8, 8], strides = [1, 1]} : vector<8x32xf32> to vector<8x8xf32>
    %20 = vector.extract_strided_slice %14 {offsets = [0, 0], sizes = [8, 8], strides = [1, 1]} : vector<8x32xf32> to vector<8x8xf32>
    %cst_15 = arith.constant dense<0.000000e+00> : vector<8x8xf32>
    %21 = tpu.matmul %18, %19, %cst_15 {dimension_numbers = #tpu.dot_dimension_numbers<[1], [1], [0], [0], [0, 0, 1, 0], [], []>} : vector<8x8xf32>, vector<8x8xf32>, vector<8x8xf32> -> vector<8x8xf32>
    %cst_16 = arith.constant dense<0xFF800000> : vector<8xf32>
    %22 = vector.multi_reduction <maximumf>, %21, %cst_16 [1] : vector<8x8xf32> to vector<8xf32>
    %23 = vector.shape_cast %22 : vector<8xf32> to vector<8x1xf32>
    %24 = vector.broadcast %23 : vector<8x1xf32> to vector<8x8xf32>
    %25 = arith.subf %21, %24 : vector<8x8xf32>
    %26 = math.exp %25 : vector<8x8xf32>
    %cst_17 = arith.constant dense<0.000000e+00> : vector<8xf32>
    %27 = vector.multi_reduction <add>, %26, %cst_17 [1] : vector<8x8xf32> to vector<8xf32>
    %28 = vector.shape_cast %27 : vector<8xf32> to vector<8x1xf32>
    %29 = tpu.reciprocal %28 {approx = true} : vector<8x1xf32> -> vector<8x1xf32>
    %30 = vector.broadcast %29 : vector<8x1xf32> to vector<8x8xf32>
    %31 = arith.mulf %26, %30 : vector<8x8xf32>
    %cst_18 = arith.constant dense<0.000000e+00> : vector<8x8xf32>
    %32 = tpu.matmul %31, %20, %cst_18 {dimension_numbers = #tpu.dot_dimension_numbers<[1], [0], [0], [1], [0, 0, 1, 1], [], []>} : vector<8x8xf32>, vector<8x8xf32>, vector<8x8xf32> -> vector<8x8xf32>
    %c0_19 = arith.constant 0 : index
    %c0_20 = arith.constant 0 : index
    %33 = vector.load %arg7[%c0_19, %c0_20] : memref<32x32xf32, #tpu.memory_space<vmem>>, vector<8x32xf32>
    %cst_21 = arith.constant dense<0.000000e+00> : vector<8x32xf32>
    %34 = tpu.matmul %32, %33, %cst_21 {dimension_numbers = #tpu.dot_dimension_numbers<[1], [0], [0], [1], [0, 0, 1, 1], [], []>} : vector<8x8xf32>, vector<8x32xf32>, vector<8x32xf32> -> vector<8x32xf32>
    %35 = arith.addf %17, %34 : vector<8x32xf32>
    %36 = vector.extract_strided_slice %15 {offsets = [0, 8], sizes = [8, 8], strides = [1, 1]} : vector<8x32xf32> to vector<8x8xf32>
    %37 = vector.extract_strided_slice %16 {offsets = [0, 8], sizes = [8, 8], strides = [1, 1]} : vector<8x32xf32> to vector<8x8xf32>
    %38 = vector.extract_strided_slice %14 {offsets = [0, 8], sizes = [8, 8], strides = [1, 1]} : vector<8x32xf32> to vector<8x8xf32>
    %cst_22 = arith.constant dense<0.000000e+00> : vector<8x8xf32>
    %39 = tpu.matmul %36, %37, %cst_22 {dimension_numbers = #tpu.dot_dimension_numbers<[1], [1], [0], [0], [0, 0, 1, 0], [], []>} : vector<8x8xf32>, vector<8x8xf32>, vector<8x8xf32> -> vector<8x8xf32>
    %cst_23 = arith.constant dense<0xFF800000> : vector<8xf32>
    %40 = vector.multi_reduction <maximumf>, %39, %cst_23 [1] : vector<8x8xf32> to vector<8xf32>
    %41 = vector.shape_cast %40 : vector<8xf32> to vector<8x1xf32>
    %42 = vector.broadcast %41 : vector<8x1xf32> to vector<8x8xf32>
    %43 = arith.subf %39, %42 : vector<8x8xf32>
    %44 = math.exp %43 : vector<8x8xf32>
    %cst_24 = arith.constant dense<0.000000e+00> : vector<8xf32>
    %45 = vector.multi_reduction <add>, %44, %cst_24 [1] : vector<8x8xf32> to vector<8xf32>
    %46 = vector.shape_cast %45 : vector<8xf32> to vector<8x1xf32>
    %47 = tpu.reciprocal %46 {approx = true} : vector<8x1xf32> -> vector<8x1xf32>
    %48 = vector.broadcast %47 : vector<8x1xf32> to vector<8x8xf32>
    %49 = arith.mulf %44, %48 : vector<8x8xf32>
    %cst_25 = arith.constant dense<0.000000e+00> : vector<8x8xf32>
    %50 = tpu.matmul %49, %38, %cst_25 {dimension_numbers = #tpu.dot_dimension_numbers<[1], [0], [0], [1], [0, 0, 1, 1], [], []>} : vector<8x8xf32>, vector<8x8xf32>, vector<8x8xf32> -> vector<8x8xf32>
    %c8 = arith.constant 8 : index
    %c0_26 = arith.constant 0 : index
    %51 = vector.load %arg7[%c8, %c0_26] : memref<32x32xf32, #tpu.memory_space<vmem>>, vector<8x32xf32>
    %cst_27 = arith.constant dense<0.000000e+00> : vector<8x32xf32>
    %52 = tpu.matmul %50, %51, %cst_27 {dimension_numbers = #tpu.dot_dimension_numbers<[1], [0], [0], [1], [0, 0, 1, 1], [], []>} : vector<8x8xf32>, vector<8x32xf32>, vector<8x32xf32> -> vector<8x32xf32>
    %53 = arith.addf %35, %52 : vector<8x32xf32>
    %54 = vector.extract_strided_slice %15 {offsets = [0, 16], sizes = [8, 8], strides = [1, 1]} : vector<8x32xf32> to vector<8x8xf32>
    %55 = vector.extract_strided_slice %16 {offsets = [0, 16], sizes = [8, 8], strides = [1, 1]} : vector<8x32xf32> to vector<8x8xf32>
    %56 = vector.extract_strided_slice %14 {offsets = [0, 16], sizes = [8, 8], strides = [1, 1]} : vector<8x32xf32> to vector<8x8xf32>
    %cst_28 = arith.constant dense<0.000000e+00> : vector<8x8xf32>
    %57 = tpu.matmul %54, %55, %cst_28 {dimension_numbers = #tpu.dot_dimension_numbers<[1], [1], [0], [0], [0, 0, 1, 0], [], []>} : vector<8x8xf32>, vector<8x8xf32>, vector<8x8xf32> -> vector<8x8xf32>
    %cst_29 = arith.constant dense<0xFF800000> : vector<8xf32>
    %58 = vector.multi_reduction <maximumf>, %57, %cst_29 [1] : vector<8x8xf32> to vector<8xf32>
    %59 = vector.shape_cast %58 : vector<8xf32> to vector<8x1xf32>
    %60 = vector.broadcast %59 : vector<8x1xf32> to vector<8x8xf32>
    %61 = arith.subf %57, %60 : vector<8x8xf32>
    %62 = math.exp %61 : vector<8x8xf32>
    %cst_30 = arith.constant dense<0.000000e+00> : vector<8xf32>
    %63 = vector.multi_reduction <add>, %62, %cst_30 [1] : vector<8x8xf32> to vector<8xf32>
    %64 = vector.shape_cast %63 : vector<8xf32> to vector<8x1xf32>
    %65 = tpu.reciprocal %64 {approx = true} : vector<8x1xf32> -> vector<8x1xf32>
    %66 = vector.broadcast %65 : vector<8x1xf32> to vector<8x8xf32>
    %67 = arith.mulf %62, %66 : vector<8x8xf32>
    %cst_31 = arith.constant dense<0.000000e+00> : vector<8x8xf32>
    %68 = tpu.matmul %67, %56, %cst_31 {dimension_numbers = #tpu.dot_dimension_numbers<[1], [0], [0], [1], [0, 0, 1, 1], [], []>} : vector<8x8xf32>, vector<8x8xf32>, vector<8x8xf32> -> vector<8x8xf32>
    %c16 = arith.constant 16 : index
    %c0_32 = arith.constant 0 : index
    %69 = vector.load %arg7[%c16, %c0_32] : memref<32x32xf32, #tpu.memory_space<vmem>>, vector<8x32xf32>
    %cst_33 = arith.constant dense<0.000000e+00> : vector<8x32xf32>
    %70 = tpu.matmul %68, %69, %cst_33 {dimension_numbers = #tpu.dot_dimension_numbers<[1], [0], [0], [1], [0, 0, 1, 1], [], []>} : vector<8x8xf32>, vector<8x32xf32>, vector<8x32xf32> -> vector<8x32xf32>
    %71 = arith.addf %53, %70 : vector<8x32xf32>
    %72 = vector.extract_strided_slice %15 {offsets = [0, 24], sizes = [8, 8], strides = [1, 1]} : vector<8x32xf32> to vector<8x8xf32>
    %73 = vector.extract_strided_slice %16 {offsets = [0, 24], sizes = [8, 8], strides = [1, 1]} : vector<8x32xf32> to vector<8x8xf32>
    %74 = vector.extract_strided_slice %14 {offsets = [0, 24], sizes = [8, 8], strides = [1, 1]} : vector<8x32xf32> to vector<8x8xf32>
    %cst_34 = arith.constant dense<0.000000e+00> : vector<8x8xf32>
    %75 = tpu.matmul %72, %73, %cst_34 {dimension_numbers = #tpu.dot_dimension_numbers<[1], [1], [0], [0], [0, 0, 1, 0], [], []>} : vector<8x8xf32>, vector<8x8xf32>, vector<8x8xf32> -> vector<8x8xf32>
    %cst_35 = arith.constant dense<0xFF800000> : vector<8xf32>
    %76 = vector.multi_reduction <maximumf>, %75, %cst_35 [1] : vector<8x8xf32> to vector<8xf32>
    %77 = vector.shape_cast %76 : vector<8xf32> to vector<8x1xf32>
    %78 = vector.broadcast %77 : vector<8x1xf32> to vector<8x8xf32>
    %79 = arith.subf %75, %78 : vector<8x8xf32>
    %80 = math.exp %79 : vector<8x8xf32>
    %cst_36 = arith.constant dense<0.000000e+00> : vector<8xf32>
    %81 = vector.multi_reduction <add>, %80, %cst_36 [1] : vector<8x8xf32> to vector<8xf32>
    %82 = vector.shape_cast %81 : vector<8xf32> to vector<8x1xf32>
    %83 = tpu.reciprocal %82 {approx = true} : vector<8x1xf32> -> vector<8x1xf32>
    %84 = vector.broadcast %83 : vector<8x1xf32> to vector<8x8xf32>
    %85 = arith.mulf %80, %84 : vector<8x8xf32>
    %cst_37 = arith.constant dense<0.000000e+00> : vector<8x8xf32>
    %86 = tpu.matmul %85, %74, %cst_37 {dimension_numbers = #tpu.dot_dimension_numbers<[1], [0], [0], [1], [0, 0, 1, 1], [], []>} : vector<8x8xf32>, vector<8x8xf32>, vector<8x8xf32> -> vector<8x8xf32>
    %c24 = arith.constant 24 : index
    %c0_38 = arith.constant 0 : index
    %87 = vector.load %arg7[%c24, %c0_38] : memref<32x32xf32, #tpu.memory_space<vmem>>, vector<8x32xf32>
    %cst_39 = arith.constant dense<0.000000e+00> : vector<8x32xf32>
    %88 = tpu.matmul %86, %87, %cst_39 {dimension_numbers = #tpu.dot_dimension_numbers<[1], [0], [0], [1], [0, 0, 1, 1], [], []>} : vector<8x8xf32>, vector<8x32xf32>, vector<8x32xf32> -> vector<8x32xf32>
    %89 = arith.addf %71, %88 : vector<8x32xf32>
    %c0_40 = arith.constant 0 : index
    %c0_41 = arith.constant 0 : index
    %90 = vector.load %arg8[%c0_40, %c0_41] : memref<1x32xf32, #tpu.memory_space<vmem>>, vector<1x32xf32>
    %91 = vector.broadcast %90 : vector<1x32xf32> to vector<8x32xf32>
    %92 = arith.addf %89, %91 : vector<8x32xf32>
    %93 = arith.addf %1, %92 : vector<8x32xf32>
    %cst_42 = arith.constant dense<0.000000e+00> : vector<8xf32>
    %94 = vector.multi_reduction <add>, %93, %cst_42 [1] : vector<8x32xf32> to vector<8xf32>
    %95 = vector.shape_cast %94 : vector<8xf32> to vector<8x1xf32>
    %cst_43 = arith.constant 3.200000e+01 : f32
    %96 = vector.broadcast %cst_43 : f32 to vector<8x1xf32>
    %97 = arith.divf %95, %96 : vector<8x1xf32>
    %98 = vector.broadcast %97 : vector<8x1xf32> to vector<8x32xf32>
    %99 = arith.subf %93, %98 : vector<8x32xf32>
    %100 = arith.mulf %99, %99 : vector<8x32xf32>
    %cst_44 = arith.constant dense<0.000000e+00> : vector<8xf32>
    %101 = vector.multi_reduction <add>, %100, %cst_44 [1] : vector<8x32xf32> to vector<8xf32>
    %102 = vector.shape_cast %101 : vector<8xf32> to vector<8x1xf32>
    %cst_45 = arith.constant 3.200000e+01 : f32
    %103 = vector.broadcast %cst_45 : f32 to vector<8x1xf32>
    %104 = arith.divf %102, %103 : vector<8x1xf32>
    %105 = vector.broadcast %97 : vector<8x1xf32> to vector<8x32xf32>
    %106 = arith.subf %93, %105 : vector<8x32xf32>
    %cst_46 = arith.constant 9.99999974E-6 : f32
    %107 = vector.broadcast %cst_46 : f32 to vector<8x1xf32>
    %108 = arith.addf %104, %107 : vector<8x1xf32>
    %109 = math.rsqrt %108 : vector<8x1xf32>
    %110 = vector.broadcast %109 : vector<8x1xf32> to vector<8x32xf32>
    %111 = arith.mulf %106, %110 : vector<8x32xf32>
    %c0_47 = arith.constant 0 : index
    %c0_48 = arith.constant 0 : index
    %112 = vector.load %arg9[%c0_47, %c0_48] : memref<1x32xf32, #tpu.memory_space<vmem>>, vector<1x32xf32>
    %113 = vector.broadcast %112 : vector<1x32xf32> to vector<8x32xf32>
    %114 = arith.mulf %111, %113 : vector<8x32xf32>
    %c0_49 = arith.constant 0 : index
    %c0_50 = arith.constant 0 : index
    %115 = vector.load %arg10[%c0_49, %c0_50] : memref<1x32xf32, #tpu.memory_space<vmem>>, vector<1x32xf32>
    %116 = vector.broadcast %115 : vector<1x32xf32> to vector<8x32xf32>
    %117 = arith.addf %114, %116 : vector<8x32xf32>
    %c0_51 = arith.constant 0 : index
    %c0_52 = arith.constant 0 : index
    %118 = vector.load %arg11[%c0_51, %c0_52] : memref<32x64xf32, #tpu.memory_space<vmem>>, vector<32x64xf32>
    %cst_53 = arith.constant dense<0.000000e+00> : vector<8x64xf32>
    %119 = tpu.matmul %117, %118, %cst_53 {dimension_numbers = #tpu.dot_dimension_numbers<[1], [0], [0], [1], [0, 0, 1, 1], [], []>} : vector<8x32xf32>, vector<32x64xf32>, vector<8x64xf32> -> vector<8x64xf32>
    %c0_54 = arith.constant 0 : index
    %c0_55 = arith.constant 0 : index
    %120 = vector.load %arg12[%c0_54, %c0_55] : memref<1x64xf32, #tpu.memory_space<vmem>>, vector<1x64xf32>
    %121 = vector.broadcast %120 : vector<1x64xf32> to vector<8x64xf32>
    %122 = arith.addf %119, %121 : vector<8x64xf32>
    %cst_56 = arith.constant 0.000000e+00 : f32
    %123 = vector.broadcast %cst_56 : f32 to vector<8x64xf32>
    %124 = arith.maximumf %122, %123 : vector<8x64xf32>
    %c0_57 = arith.constant 0 : index
    %c0_58 = arith.constant 0 : index
    %125 = vector.load %arg13[%c0_57, %c0_58] : memref<64x32xf32, #tpu.memory_space<vmem>>, vector<64x32xf32>
    %cst_59 = arith.constant dense<0.000000e+00> : vector<8x32xf32>
    %126 = tpu.matmul %124, %125, %cst_59 {dimension_numbers = #tpu.dot_dimension_numbers<[1], [0], [0], [1], [0, 0, 1, 1], [], []>} : vector<8x64xf32>, vector<64x32xf32>, vector<8x32xf32> -> vector<8x32xf32>
    %c0_60 = arith.constant 0 : index
    %c0_61 = arith.constant 0 : index
    %127 = vector.load %arg14[%c0_60, %c0_61] : memref<1x32xf32, #tpu.memory_space<vmem>>, vector<1x32xf32>
    %128 = vector.broadcast %127 : vector<1x32xf32> to vector<8x32xf32>
    %129 = arith.addf %126, %128 : vector<8x32xf32>
    %130 = arith.addf %117, %129 : vector<8x32xf32>
    %cst_62 = arith.constant dense<0.000000e+00> : vector<8xf32>
    %131 = vector.multi_reduction <add>, %130, %cst_62 [1] : vector<8x32xf32> to vector<8xf32>
    %132 = vector.shape_cast %131 : vector<8xf32> to vector<8x1xf32>
    %cst_63 = arith.constant 3.200000e+01 : f32
    %133 = vector.broadcast %cst_63 : f32 to vector<8x1xf32>
    %134 = arith.divf %132, %133 : vector<8x1xf32>
    %135 = vector.broadcast %134 : vector<8x1xf32> to vector<8x32xf32>
    %136 = arith.subf %130, %135 : vector<8x32xf32>
    %137 = arith.mulf %136, %136 : vector<8x32xf32>
    %cst_64 = arith.constant dense<0.000000e+00> : vector<8xf32>
    %138 = vector.multi_reduction <add>, %137, %cst_64 [1] : vector<8x32xf32> to vector<8xf32>
    %139 = vector.shape_cast %138 : vector<8xf32> to vector<8x1xf32>
    %cst_65 = arith.constant 3.200000e+01 : f32
    %140 = vector.broadcast %cst_65 : f32 to vector<8x1xf32>
    %141 = arith.divf %139, %140 : vector<8x1xf32>
    %142 = vector.broadcast %134 : vector<8x1xf32> to vector<8x32xf32>
    %143 = arith.subf %130, %142 : vector<8x32xf32>
    %cst_66 = arith.constant 9.99999974E-6 : f32
    %144 = vector.broadcast %cst_66 : f32 to vector<8x1xf32>
    %145 = arith.addf %141, %144 : vector<8x1xf32>
    %146 = math.rsqrt %145 : vector<8x1xf32>
    %147 = vector.broadcast %146 : vector<8x1xf32> to vector<8x32xf32>
    %148 = arith.mulf %143, %147 : vector<8x32xf32>
    %c0_67 = arith.constant 0 : index
    %c0_68 = arith.constant 0 : index
    %149 = vector.load %arg15[%c0_67, %c0_68] : memref<1x32xf32, #tpu.memory_space<vmem>>, vector<1x32xf32>
    %150 = vector.broadcast %149 : vector<1x32xf32> to vector<8x32xf32>
    %151 = arith.mulf %148, %150 : vector<8x32xf32>
    %c0_69 = arith.constant 0 : index
    %c0_70 = arith.constant 0 : index
    %152 = vector.load %arg16[%c0_69, %c0_70] : memref<1x32xf32, #tpu.memory_space<vmem>>, vector<1x32xf32>
    %153 = vector.broadcast %152 : vector<1x32xf32> to vector<8x32xf32>
    %154 = arith.addf %151, %153 : vector<8x32xf32>
    %c0_71 = arith.constant 0 : index
    %c0_72 = arith.constant 0 : index
    %c0_73 = arith.constant 0 : index
    %155 = vector.load %arg17[%c0_71, %c0_72, %c0_73] : memref<1x8x32xf32, #tpu.memory_space<vmem>>, vector<1x8x32xf32>
    %156 = vector.shape_cast %155 : vector<1x8x32xf32> to vector<8x32xf32>
    %157 = vector.shape_cast %154 : vector<8x32xf32> to vector<1x8x32xf32>
    tpu.vector_store %arg17[%c0_71, %c0_72, %c0_73], %157 {strides = array<i32>} : memref<1x8x32xf32, #tpu.memory_space<vmem>>, vector<1x8x32xf32>,
    return
  }
  func.func @transform_0(%arg0: i32) -> (i32, i32, i32) {
    %c0_i32 = arith.constant 0 : i32
    %c0_i32_0 = arith.constant 0 : i32
    %c0_i32_1 = arith.constant 0 : i32
    return %arg0, %c0_i32, %c0_i32_0 : i32, i32, i32
  }
  func.func @transform_1(%arg0: i32) -> (i32, i32, i32) {
    %c0_i32 = arith.constant 0 : i32
    %c0_i32_0 = arith.constant 0 : i32
    %c0_i32_1 = arith.constant 0 : i32
    return %arg0, %c0_i32, %c0_i32_0 : i32, i32, i32
  }
  func.func @transform_2(%arg0: i32) -> (i32, i32) {
    %c0_i32 = arith.constant 0 : i32
    %c0_i32_0 = arith.constant 0 : i32
    %c0_i32_1 = arith.constant 0 : i32
    return %c0_i32, %c0_i32_0 : i32, i32
  }
  func.func @transform_3(%arg0: i32) -> (i32, i32) {
    %c0_i32 = arith.constant 0 : i32
    %c0_i32_0 = arith.constant 0 : i32
    %c0_i32_1 = arith.constant 0 : i32
    return %c0_i32, %c0_i32_0 : i32, i32
  }
  func.func @transform_4(%arg0: i32) -> (i32, i32) {
    %c0_i32 = arith.constant 0 : i32
    %c0_i32_0 = arith.constant 0 : i32
    %c0_i32_1 = arith.constant 0 : i32
    return %c0_i32, %c0_i32_0 : i32, i32
  }
  func.func @transform_5(%arg0: i32) -> (i32, i32) {
    %c0_i32 = arith.constant 0 : i32
    %c0_i32_0 = arith.constant 0 : i32
    %c0_i32_1 = arith.constant 0 : i32
    return %c0_i32, %c0_i32_0 : i32, i32
  }
  func.func @transform_6(%arg0: i32) -> (i32, i32) {
    %c0_i32 = arith.constant 0 : i32
    %c0_i32_0 = arith.constant 0 : i32
    %c0_i32_1 = arith.constant 0 : i32
    return %c0_i32, %c0_i32_0 : i32, i32
  }
  func.func @transform_7(%arg0: i32) -> (i32, i32) {
    %c0_i32 = arith.constant 0 : i32
    %c0_i32_0 = arith.constant 0 : i32
    %c0_i32_1 = arith.constant 0 : i32
    return %c0_i32, %c0_i32_0 : i32, i32
  }
  func.func @transform_8(%arg0: i32) -> (i32, i32) {
    %c0_i32 = arith.constant 0 : i32
    %c0_i32_0 = arith.constant 0 : i32
    %c0_i32_1 = arith.constant 0 : i32
    return %c0_i32, %c0_i32_0 : i32, i32
  }
  func.func @transform_9(%arg0: i32) -> (i32, i32) {
    %c0_i32 = arith.constant 0 : i32
    %c0_i32_0 = arith.constant 0 : i32
    %c0_i32_1 = arith.constant 0 : i32
    return %c0_i32, %c0_i32_0 : i32, i32
  }
  func.func @transform_10(%arg0: i32) -> (i32, i32) {
    %c0_i32 = arith.constant 0 : i32
    %c0_i32_0 = arith.constant 0 : i32
    %c0_i32_1 = arith.constant 0 : i32
    return %c0_i32, %c0_i32_0 : i32, i32
  }
  func.func @transform_11(%arg0: i32) -> (i32, i32) {
    %c0_i32 = arith.constant 0 : i32
    %c0_i32_0 = arith.constant 0 : i32
    %c0_i32_1 = arith.constant 0 : i32
    return %c0_i32, %c0_i32_0 : i32, i32
  }
  func.func @transform_12(%arg0: i32) -> (i32, i32) {
    %c0_i32 = arith.constant 0 : i32
    %c0_i32_0 = arith.constant 0 : i32
    %c0_i32_1 = arith.constant 0 : i32
    return %c0_i32, %c0_i32_0 : i32, i32
  }
  func.func @transform_13(%arg0: i32) -> (i32, i32) {
    %c0_i32 = arith.constant 0 : i32
    %c0_i32_0 = arith.constant 0 : i32
    %c0_i32_1 = arith.constant 0 : i32
    return %c0_i32, %c0_i32_0 : i32, i32
  }
  func.func @transform_14(%arg0: i32) -> (i32, i32) {
    %c0_i32 = arith.constant 0 : i32
    %c0_i32_0 = arith.constant 0 : i32
    %c0_i32_1 = arith.constant 0 : i32
    return %c0_i32, %c0_i32_0 : i32, i32
  }
  func.func @transform_15(%arg0: i32) -> (i32, i32) {
    %c0_i32 = arith.constant 0 : i32
    %c0_i32_0 = arith.constant 0 : i32
    %c0_i32_1 = arith.constant 0 : i32
    return %c0_i32, %c0_i32_0 : i32, i32
  }
  func.func @transform_16(%arg0: i32) -> (i32, i32, i32) {
    %c0_i32 = arith.constant 0 : i32
    %c0_i32_0 = arith.constant 0 : i32
    %c0_i32_1 = arith.constant 0 : i32
    return %arg0, %c0_i32, %c0_i32_0 : i32, i32, i32
  }
}

</mosaic_0001>

<bundles_post_ra>
// kernel: transformer_encoder_pallas.2
= control target key start
LH: loop header
LB: loop body
LE: loop exit
PB: predicated region body
PF: predicated region fallthrough
CT: control target
= control target key end

     0   :  { %s2341_s21 = smov 0   ;;  %s2578_s0 = inlined_call_operand.vmem [shape: f32[2,8,32], index: 0, kind: input, shape index: {}, may-alias: {0,16}]   ;;  %s2579_s1 = inlined_call_operand.vmem [shape: f32[2,8,32], index: 1, kind: input, shape index: {}]   ;;  %s2580_s2 = inlined_call_operand.vmem [shape: f32[32,64], index: 2, kind: input, shape index: {}]   ;;  %s2581_s3 = inlined_call_operand.vmem [shape: f32[1,64], index: 3, kind: input, shape index: {}]   ;;  %s2582_s4 = inlined_call_operand.vmem [shape: f32[32,32], index: 4, kind: input, shape index: {}]   ;;  %s2583_s5 = inlined_call_operand.vmem [shape: f32[1,32], index: 5, kind: input, shape index: {}]   ;;  %s2584_s6 = inlined_call_operand.vmem [shape: f32[32,32], index: 6, kind: input, shape index: {}]   ;;  %s2585_s7 = inlined_call_operand.vmem [shape: f32[1,32], index: 7, kind: input, shape index: {}]   ;;  %s2586_s8 = inlined_call_operand.vmem [shape: f32[1,32], index: 8, kind: input, shape index: {}]   ;;  %s2587_s9 = inlined_call_operand.vmem [shape: f32[1,32], index: 9, kind: input, shape index: {}]   ;;  %s2588_s10 = inlined_call_operand.vmem [shape: f32[32,64], index: 10, kind: input, shape index: {}]   ;;  %s2589_s11 = inlined_call_operand.vmem [shape: f32[1,64], index: 11, kind: input, shape index: {}]   ;;  %s2590_s12 = inlined_call_operand.vmem [shape: f32[64,32], index: 12, kind: input, shape index: {}]   ;;  %s2591_s13 = inlined_call_operand.vmem [shape: f32[1,32], index: 13, kind: input, shape index: {}]   ;;  %s2592_s14 = inlined_call_operand.vmem [shape: f32[1,32], index: 14, kind: input, shape index: {}]   ;;  %s2593_s15 = inlined_call_operand.vmem [shape: f32[1,32], index: 15, kind: input, shape index: {}]   ;;  %s2594_s16 = inlined_call_operand.vmem [shape: f32[2,8,32], index: 16, kind: output, shape index: {}, may-alias: {0,16}]  }
   0x1   :  { %2595 = sst [smem:[#allocation2_spill]] %s2578_s0 }
   0x2 LB: > { %s1971_s22 = sadd.s32 4294967295, %s2244_s21   ;;  %p1975_p0 = scmp.ge.s32.totalorder %s2244_s21, 1  ;;  %s2244_s21 = sphi %s2341_s21, %s26_s21  }
   0x3   : > { %p470_p1 = scmp.lt.s32.totalorder %s2244_s21, 3 }
   0x5   : > { %p471_p2 = pnand %p1975_p0, %p470_p1 }
   0x6   : > { %v537_v0 = vld [vmem:[%s2580_s2] sm:$0xff] (!%p471_p2)  ;;  %v538_v1 = vld [vmem:[%s2580_s2 + $0x8] sm:$0xff] (!%p471_p2)  ;;  %v539_v2 = vld [vmem:[%s2580_s2 + $0x10] sm:$0xff] (!%p471_p2)  ;;  %v2246_v3 = vmov (!%p471_p2), 0.0|0.0   ;;  %vm2247_vm0 = vmmov (!%p471_p2), 0   ;;  %v2248_v6 = vmov (!%p471_p2), 0.0  }
   0x7   : > { %474 = sbr.rel (%p471_p2) target bundleno = 4170 (0x104a), region = 84  ;;  %2170 = vmatprep.subr.bf16.mxu0 (!%p471_p2), %v2246_v3  ;;  %v2171_v4 = vpack.c.bf16 (!%p471_p2), %v538_v1, %v537_v0  ;;  %v540_v5 = vld [vmem:[%s2580_s2 + $0x18] sm:$0xff] (!%p471_p2)  ;;  %2066 = vmatprep.mubr.msk.f32.mxu0 (!%p471_p2), %vm2247_vm0, %v2248_v6  ;;  %p522_p3 = scmp.lt.s32.totalorder (!%p471_p2), %s1971_s22, 1  ;;  %vm548_vm1 = vcmask (!%p471_p2), 261120   ;;  %v1979_v11 = vld [vmem:[%s2581_s3] ss:$0 sm:$0xff] (!%p471_p2) }
   0x8   : > { %2176 = vmatprep.subr.bf16.mxu1 (!%p471_p2), %v2246_v3  ;;  %2077 = vmatprep.mubr.msk.f32.mxu1 (!%p471_p2), %vm2247_vm0, %v2248_v6  ;;  %v2174_v7 = vpack.c.bf16 (!%p471_p2), %v540_v5, %v539_v2  ;;  %s2596_s19 = sld [smem:[#allocation2_spill]] (!%p471_p2)  ;;  %s2249_s27 = smov (!%p471_p2), 88   ;;  %vm709_vm2 = vcmask (!%p471_p2), 64512   ;;  %v622_v16 = vld [vmem:[%s2582_s4] sm:$0xff] (!%p471_p2)  ;;  %v623_v17 = vld [vmem:[%s2582_s4 + $0x8] sm:$0xff] (!%p471_p2)  ;;  %v624_v18 = vld [vmem:[%s2582_s4 + $0x10] sm:$0xff] (!%p471_p2) }
   0x9   : > { %2172 = vmatpush3.bf16.msra.mxu0 (!%p471_p2), %v2171_v4  ;;  %s2250_s28 = smov (!%p471_p2), 96   ;;  %v2177_v19 = vpack.c.bf16 (!%p471_p2), %v623_v17, %v622_v16  ;;  %v625_v20 = vld [vmem:[%s2582_s4 + $0x18] sm:$0xff] (!%p471_p2)  ;;  %v1981_v30 = vld [vmem:[%s2583_s5] ss:$0 sm:$0xff] (!%p471_p2)  ;;  %v1035_v49 = vld [vmem:[%s2584_s6 + $0x8] sm:$0xff] (!%p471_p2)  ;;  %vm1801_vm3 = vcmask (!%p471_p2), 523264  }
   0xa   : > { %2173 = vmatprep.subr.bf16.mxu0 (!%p471_p2), %v2246_v3  ;;  %v2180_v21 = vpack.c.bf16 (!%p471_p2), %v625_v20, %v624_v18  ;;  %v868_v54 = vld [vmem:[%s2584_s6] sm:$0xff] (!%p471_p2) }
   0xb   : > { %2178 = vmatpush3.bf16.msra.mxu1 (!%p471_p2), %v2177_v19 }
   0xc   : > { %2179 = vmatprep.subr.bf16.mxu1 (!%p471_p2), %v2246_v3 }
   0xd   : > { %2175 = vmatpush3.bf16.msra.mxu0 (!%p471_p2), %v2174_v7 }
   0xe   : > { %s2598_s22 = smov (!%p522_p3, %s1971_s22), 1  ;;  %2080 = vmatprep.subr.mxu0 %v2248_v6 }
   0xf   : > { %s2368_s0 = sshll.u32 %s2598_s22, 3  ;;  %2181 = vmatpush3.bf16.msra.mxu1 %v2180_v21 }
  0x10   : > { %s525_s20 = scalar_lea.vmem %s2596_s19, %s2368_s0  ;;  %s529_s25 = scalar_lea.vmem %s2579_s1, %s2368_s0  ;;  %2095 = vmatprep.subr.mxu1 %v2248_v6 }
  0x11   : > { %v2378_v8 = vld [vmem:[%s525_s20] sm:$0xff]  ;;  %s2254_s19 = smov 104   ;;  %s2255_s20 = smov 72  }
  0x12   : > { %v535_v9 = vld [vmem:[%s529_s25] sm:$0xff]  ;;  %2078 = vmatmul.mubr.msk.f32.vlgmr.msra.gmra.mrb[0].mxu1 %vm548_vm1, %v2378_v8  ;;  %s2251_s25 = smov 120  }
  0x13   : > { %v536_v10 = vadd.f32 %v535_v9, %v2378_v8  ;;  %2097 = vmatprep.mubr.msk.f32.mxu1 %vm2247_vm0, %v2248_v6 }
  0x15   : > { %2067 = vmatmul.mubr.msk.f32.vlgmr.msra.gmra.mrb[0].mxu0 %vm548_vm1, %v536_v10 }
  0x16   : > { %2082 = vmatprep.mubr.msk.f32.mxu0 %vm2247_vm0, %v2248_v6 }
  0xe5   : > { %v702_v31 = vpop.f32.mrb[0].mxu1 }
  0xe6   : > { %v2423_v32 = vadd.f32 %v1981_v30, %v702_v31  ;;  %v2079_v33 = vpop.f32.mrb[1].mxu1 }
  0xe8   : > { %v618_v12 = vpop.f32.mrb[0].mxu0 }
  0xe9   : > { %v2388_v13 = vadd.f32 %v1979_v11, %v618_v12  ;;  %v2068_v14 = vpop.f32.mrb[1].mxu0 }
  0xeb   : > { %871 = vrot.lane.b32.xlu1 %v2388_v13, %s2249_s27  ;;  %707 = vrot.lane.b32.xlu0 %v2388_v13, %s2250_s28  ;;  %s2252_s27 = smov 112   ;;  %s2253_s28 = smov 80  }
 0x15d   : > { %v708_v15 = vpop.permute.xlu0 %707  ;;  %v872_v34 = vpop.permute.xlu1 %871 }
 0x15e   : > { %2081 = vmatpush3.xpose.msk.msra.mxu0 %vm709_vm2, %v708_v15 }
 0x15f   : > { %2085 = vmatprep.subr.mxu0 %v2248_v6 }
 0x161   : > { %2083 = vmatmul.mubr.msk.f32.vlgmr.msra.gmra.mrb[2].mxu0 %vm709_vm2, %v2388_v13 }
 0x162   : > { %2087 = vmatprep.mubr.msk.f32.mxu0 %vm2247_vm0, %v2248_v6  ;;  %2086 = vmatpush3.msra.mxu0 %v2423_v32 }
 0x163   : > { %2090 = vmatprep.subr.mxu0 %v2248_v6 }
 0x234   : > { %v780_v22 = vpop.f32.mrb[2].mxu0 }
 0x235   : > { %v2084_v23 = vpop.f32.mrb[3].mxu0  ;;  %v784_v24 = vsel %vm709_vm2, %v780_v22, -inf }
 0x236   : > { %785 = vmax.xlane.f32.xlu0 %v784_v24 }
 0x2c3   : > { %v786_v25 = vpop.xlane.xlu0 %785 }
 0x2c4   : > { %v787_v26 = vsub.f32 %v780_v22, %v786_v25 }
 0x2c6   : > { %v788_v27 = vmul.f32 1.442695, %v787_v26 }
 0x2c8   : > { %2218 = vpow2.f32 %v788_v27 }
 0x2d2   : > { %v2219_v28 = vpop.eup %2218 }
 0x2d3   : > { %v790_v29 = vsel %vm709_vm2, %v2219_v28, 0.0 }
 0x2d4   : > { %791 = vadd.xlane.f32.xlu1 %v790_v29  ;;  %v1587_v29 = vld [vmem:[%s2584_s6 + $0x18] sm:$0xff] }
 0x2e5   : > { %869 = vrot.lane.b32.xlu1 %v2388_v13, %s2251_s25 }
 0x361   : > { %v792_v35 = vpop.xlane.xlu1 %791 }
 0x362   : > { %2220 = vrcp.f32 %v792_v35 }
 0x365   : > { %v870_v38 = vpop.permute.xlu1 %869 }
 0x36c   : > { %v2221_v36 = vpop.eup %2220 }
 0x36d   : > { %v794_v37 = vmul.f32 %v2221_v36, %v2219_v28 }
 0x36f   : > { %2088 = vmatmul.mubr.msk.f32.vlgmr.msra.gmra.mrb[4].mxu0 %vm709_vm2, %v794_v37 }
 0x370   : > { %2091 = vmatpush3.xpose.msk.msra.mxu0 %vm709_vm2, %v872_v34  ;;  %2092 = vmatprep.mubr.msk.f32.mxu0 %vm2247_vm0, %v2248_v6 }
 0x371   : > { %2100 = vmatprep.subr.mxu0 %v2248_v6 }
 0x373   : > { %2093 = vmatmul.mubr.msk.f32.vlgmr.msra.gmra.mrb[6].mxu0 %vm709_vm2, %v870_v38 }
 0x374   : > { %2102 = vmatprep.mubr.msk.f32.mxu0 %vm2247_vm0, %v2248_v6  ;;  %2101 = vmatpush3.msra.mxu0 %v1035_v49 }
 0x375   : > { %2110 = vmatprep.subr.mxu0 %v2248_v6 }
 0x442   : > { %v864_v39 = vpop.f32.mrb[4].mxu0 }
 0x443   : > { %v2089_v40 = vpop.f32.mrb[5].mxu0 }
 0x446   : > { %v943_v41 = vpop.f32.mrb[6].mxu0 }
 0x447   : > { %v2094_v42 = vpop.f32.mrb[7].mxu0  ;;  %v947_v43 = vsel %vm709_vm2, %v943_v41, -inf }
 0x448   : > { %948 = vmax.xlane.f32.xlu1 %v947_v43 }
 0x459   : > { %1182 = vrot.lane.b32.xlu1 %v2388_v13, %s2252_s27 }
 0x4d5   : > { %v949_v44 = vpop.xlane.xlu1 %948 }
 0x4d6   : > { %v950_v45 = vsub.f32 %v943_v41, %v949_v44 }
 0x4d8   : > { %v951_v46 = vmul.f32 1.442695, %v950_v45 }
 0x4d9   : > { %v1183_v58 = vpop.permute.xlu1 %1182 }
 0x4da   : > { %2222 = vpow2.f32 %v951_v46 }
 0x4e4   : > { %v2223_v47 = vpop.eup %2222 }
 0x4e5   : > { %v953_v48 = vsel %vm709_vm2, %v2223_v47, 0.0 }
 0x4e6   : > { %954 = vadd.xlane.f32.xlu0 %v953_v48 }
 0x4fc   : > { %959 = vrot.lane.b32.xlu0 %v2423_v32, %s2251_s25 }
 0x500   : > { %1184 = vrot.lane.b32.xlu0 %v2388_v13, %s2253_s28 }
 0x573   : > { %v955_v50 = vpop.xlane.xlu0 %954 }
 0x574   : > { %2224 = vrcp.f32 %v955_v50  ;;  %v1702_v50 = vld [vmem:[%s2588_s10 + $0x8] sm:$0xff] }
 0x577   : > { %v960_v51 = vpop.permute.xlu0 %959 }
 0x578   : > { %2096 = vmatpush3.msra.mxu1 %v960_v51 }
 0x579   : > { %2105 = vmatprep.subr.mxu1 %v2248_v6 }
 0x57b   : > { %v1185_v56 = vpop.permute.xlu0 %1184 }
 0x57e   : > { %v2225_v52 = vpop.eup %2224 }
 0x57f   : > { %v957_v53 = vmul.f32 %v2225_v52, %v2223_v47  ;;  %v1704_v52 = vld [vmem:[%s2588_s10 + $0x18] sm:$0xff] }
 0x581   : > { %2098 = vmatmul.mubr.msk.f32.vlgmr.msra.gmra.mrb[2].mxu1 %vm709_vm2, %v957_v53 }
 0x582   : > { %2106 = vmatpush3.msra.mxu1 %v868_v54  ;;  %2107 = vmatprep.mubr.msk.f32.mxu1 %vm2247_vm0, %v2248_v6  ;;  %v1786_v54 = vld [vmem:[%s2590_s12] sm:$0xff] }
 0x583   : > { %2115 = vmatprep.subr.mxu1 %v2248_v6 }
 0x585   : > { %2108 = vmatmul.mubr.msk.f32.vlgmr.msra.gmra.mrb[4].mxu1 %vm709_vm2, %v864_v39  ;;  %v1999_v39 = vld [vmem:[%s2585_s7] ss:$0 sm:$0xff] }
 0x586   : > { %2117 = vmatprep.mubr.msk.f32.mxu1 %vm2247_vm0, %v2248_v6 }
 0x654   : > { %v1031_v55 = vpop.f32.mrb[2].mxu1 }
 0x655   : > { %v2099_v57 = vpop.f32.mrb[3].mxu1  ;;  %2103 = vmatmul.mubr.msk.f32.vlgmr.msra.gmra.mrb[8].mxu0 %vm709_vm2, %v1031_v55  ;;  %v1787_v55 = vld [vmem:[%s2590_s12 + $0x8] sm:$0xff] }
 0x656   : > { %2111 = vmatpush3.xpose.msk.msra.mxu0 %vm709_vm2, %v1185_v56  ;;  %2112 = vmatprep.mubr.msk.f32.mxu0 %vm2247_vm0, %v2248_v6  ;;  %v1788_v56 = vld [vmem:[%s2590_s12 + $0x10] sm:$0xff]  ;;  %v2189_v57 = vpack.c.bf16 %v1787_v55, %v1786_v54 }
 0x657   : > { %2120 = vmatprep.subr.mxu0 %v2248_v6 }
 0x658   : > { %v1178_v59 = vpop.f32.mrb[4].mxu1 }
 0x659   : > { %v2109_v60 = vpop.f32.mrb[5].mxu1  ;;  %2113 = vmatmul.mubr.msk.f32.vlgmr.msra.gmra.mrb[10].mxu0 %vm709_vm2, %v1183_v58  ;;  %v1789_v58 = vld [vmem:[%s2590_s12 + $0x18] sm:$0xff] }
 0x65a   : > { %2122 = vmatprep.mubr.msk.f32.mxu0 %vm2247_vm0, %v2248_v6  ;;  %v1790_v60 = vld [vmem:[%s2590_s12 + $0x20] sm:$0xff] }
 0x728   : > { %v1105_v61 = vpop.f32.mrb[8].mxu0 }
 0x729   : > { %v1179_v62 = vadd.f32 %v1178_v59, %v1105_v61  ;;  %v2104_v63 = vpop.f32.mrb[9].mxu0  ;;  %v2192_v59 = vpack.c.bf16 %v1789_v58, %v1788_v56  ;;  %v1791_v61 = vld [vmem:[%s2590_s12 + $0x28] sm:$0xff] }
 0x72c   : > { %v1256_v0 = vpop.f32.mrb[10].mxu0 }
 0x72d   : > { %v2114_v1 = vpop.f32.mrb[11].mxu0  ;;  %v1260_v2 = vsel %vm709_vm2, %v1256_v0, -inf }
 0x72e   : > { %1261 = vmax.xlane.f32.xlu0 %v1260_v2 }
 0x744   : > { %1271 = vrot.lane.b32.xlu0 %v2423_v32, %s2252_s27  ;;  %s533_s27 = scalar_lea.vmem %s2594_s16, %s2368_s0 }
 0x748   : > { %1422 = vrot.lane.b32.xlu0 %v2388_v13, %s2254_s19 }
 0x7bb   : > { %v1262_v4 = vpop.xlane.xlu0 %1261 }
 0x7bc   : > { %v1263_v5 = vsub.f32 %v1256_v0, %v1262_v4  ;;  %v2000_v4 = vld [vmem:[%s2586_s8] ss:$0 sm:$0xff] }
 0x7be   : > { %v1264_v7 = vmul.f32 1.442695, %v1263_v5 }
 0x7bf   : > { %v1272_v9 = vpop.permute.xlu0 %1271 }
 0x7c0   : > { %2226 = vpow2.f32 %v1264_v7  ;;  %2116 = vmatpush3.msra.mxu1 %v1272_v9  ;;  %v2001_v7 = vld [vmem:[%s2587_s9] ss:$0 sm:$0xff] }
 0x7c1   : > { %2125 = vmatprep.subr.mxu1 %v2248_v6 }
 0x7c3   : > { %v1423_v17 = vpop.permute.xlu0 %1422 }
 0x7ca   : > { %v2227_v10 = vpop.eup %2226 }
 0x7cb   : > { %v1266_v11 = vsel %vm709_vm2, %v2227_v10, 0.0 }
 0x7cc   : > { %1267 = vadd.xlane.f32.xlu1 %v1266_v11  ;;  %v1793_v11 = vld [vmem:[%s2590_s12 + $0x38] sm:$0xff] }
 0x7dd   : > { %1424 = vrot.lane.b32.xlu1 %v2388_v13, %s2255_s20  ;;  %v1347_v13 = vld [vmem:[%s2584_s6 + $0x10] sm:$0xff] }
 0x7de   : > { %2121 = vmatpush3.msra.mxu0 %v1347_v13 }
 0x7df   : > { %2130 = vmatprep.subr.mxu0 %v2248_v6 }
 0x859   : > { %v1268_v12 = vpop.xlane.xlu1 %1267 }
 0x85a   : > { %2228 = vrcp.f32 %v1268_v12 }
 0x85d   : > { %v1425_v16 = vpop.permute.xlu1 %1424 }
 0x864   : > { %v2229_v14 = vpop.eup %2228 }
 0x865   : > { %v1270_v15 = vmul.f32 %v2229_v14, %v2227_v10  ;;  %v2002_v14 = vld [vmem:[%s2589_s11] ss:$0 sm:$0xff] }
 0x867   : > { %2118 = vmatmul.mubr.msk.f32.vlgmr.msra.gmra.mrb[6].mxu1 %vm709_vm2, %v1270_v15 }
 0x868   : > { %2126 = vmatpush3.xpose.msk.msra.mxu1 %vm709_vm2, %v1425_v16  ;;  %2127 = vmatprep.mubr.msk.f32.mxu1 %vm2247_vm0, %v2248_v6 }
 0x869   : > { %2135 = vmatprep.subr.mxu1 %v2248_v6 }
 0x86b   : > { %2128 = vmatmul.mubr.msk.f32.vlgmr.msra.gmra.mrb[8].mxu1 %vm709_vm2, %v1423_v17 }
 0x86c   : > { %2137 = vmatprep.mubr.msk.f32.mxu1 %vm2247_vm0, %v2248_v6  ;;  %2136 = vmatpush3.msra.mxu1 %v1587_v29 }
 0x86d   : > { %2188 = vmatprep.subr.bf16.mxu1 %v2246_v3 }
 0x93a   : > { %v1343_v18 = vpop.f32.mrb[6].mxu1 }
 0x93b   : > { %v2119_v19 = vpop.f32.mrb[7].mxu1  ;;  %2123 = vmatmul.mubr.msk.f32.vlgmr.msra.gmra.mrb[12].mxu0 %vm709_vm2, %v1343_v18  ;;  %v2004_v18 = vld [vmem:[%s2591_s13] ss:$0 sm:$0xff] }
 0x93c   : > { %2132 = vmatprep.mubr.msk.f32.mxu0 %vm2247_vm0, %v2248_v6 }
 0x93e   : > { %v1496_v20 = vpop.f32.mrb[8].mxu1 }
 0x93f   : > { %v2129_v21 = vpop.f32.mrb[9].mxu1  ;;  %v1500_v22 = vsel %vm709_vm2, %v1496_v20, -inf }
 0x940   : > { %1501 = vmax.xlane.f32.xlu0 %v1500_v22 }
 0x956   : > { %1511 = vrot.lane.b32.xlu0 %v2423_v32, %s2254_s19 }
 0x9cd   : > { %v1502_v23 = vpop.xlane.xlu0 %1501 }
 0x9ce   : > { %v1503_v24 = vsub.f32 %v1496_v20, %v1502_v23 }
 0x9d0   : > { %v1504_v25 = vmul.f32 1.442695, %v1503_v24 }
 0x9d1   : > { %v1512_v26 = vpop.permute.xlu0 %1511 }
 0x9d2   : > { %2230 = vpow2.f32 %v1504_v25  ;;  %2131 = vmatpush3.msra.mxu0 %v1512_v26 }
 0x9d3   : > { %2182 = vmatprep.subr.bf16.mxu0 %v2246_v3 }
 0x9dc   : > { %v2231_v27 = vpop.eup %2230 }
 0x9dd   : > { %v1506_v28 = vsel %vm709_vm2, %v2231_v27, 0.0 }
 0x9de   : > { %1507 = vadd.xlane.f32.xlu1 %v1506_v28 }
 0xa0e   : > { %v1417_v30 = vpop.f32.mrb[12].mxu0 }
 0xa0f   : > { %v1421_v31 = vadd.f32 %v1417_v30, %v1179_v62  ;;  %v2124_v32 = vpop.f32.mrb[13].mxu0  ;;  %v2195_v62 = vpack.c.bf16 %v1791_v61, %v1790_v60 }
 0xa6b   : > { %v1508_v33 = vpop.xlane.xlu1 %1507 }
 0xa6c   : > { %2232 = vrcp.f32 %v1508_v33  ;;  %v2006_v33 = vld [vmem:[%s2592_s14] ss:$0 sm:$0xff] }
 0xa76   : > { %v2233_v34 = vpop.eup %2232 }
 0xa77   : > { %v1510_v35 = vmul.f32 %v2233_v34, %v2231_v27 }
 0xa79   : > { %2133 = vmatmul.mubr.msk.f32.vlgmr.msra.gmra.mrb[14].mxu0 %vm709_vm2, %v1510_v35  ;;  %v2007_v35 = vld [vmem:[%s2593_s15] ss:$0 sm:$0xff] }
 0xa7a   : > { %2148 = vmatprep.mubr.msk.f32.mxu0 %vm2247_vm0, %v2248_v6 }
 0xb4c   : > { %v1583_v36 = vpop.f32.mrb[14].mxu0 }
 0xb4d   : > { %v2134_v37 = vpop.f32.mrb[15].mxu0  ;;  %2138 = vmatmul.mubr.msk.f32.vlgmr.msra.gmra.mrb[10].mxu1 %vm709_vm2, %v1583_v36 }
 0xb4e   : > { %2167 = vmatprep.mubr.msk.f32.mxu1 %vm2247_vm0, %v2248_v6  ;;  %v1701_v6 = vld [vmem:[%s2588_s10] sm:$0xff]  ;;  %2190 = vmatpush3.bf16.msra.mxu1 %v2189_v57 }
 0xb4f   : > { %v2183_v51 = vpack.c.bf16 %v1702_v50, %v1701_v6  ;;  %2191 = vmatprep.subr.bf16.mxu1 %v2246_v3 }
 0xb51   : > { %2184 = vmatpush3.bf16.msra.mxu0 %v2183_v51 }
 0xb52   : > { %2185 = vmatprep.subr.bf16.mxu0 %v2246_v3  ;;  %2193 = vmatpush3.bf16.msra.mxu1 %v2192_v59 }
 0xb53   : > { %2194 = vmatprep.subr.bf16.mxu1 %v2246_v3 }
 0xb56   : > { %2196 = vmatpush3.bf16.msra.mxu1 %v2195_v62 }
 0xb57   : > { %2197 = vmatprep.subr.bf16.mxu1 %v2246_v3  ;;  %v1792_v3 = vld [vmem:[%s2590_s12 + $0x30] sm:$0xff] }
 0xb58   : > { %v2198_v12 = vpack.c.bf16 %v1793_v11, %v1792_v3 }
 0xb5a   : > { %2199 = vmatpush3.bf16.msra.mxu1 %v2198_v12 }
 0xc20   : > { %v1657_v38 = vpop.f32.mrb[10].mxu1 }
 0xc21   : > { %v1661_v40 = vadd.f32 %v1657_v38, %v1421_v31  ;;  %v2139_v41 = vpop.f32.mrb[11].mxu1 }
 0xc23   : > { %v1669_v42 = vadd.f32 %v1999_v39, %v1661_v40 }
 0xc25   : > { %v1670_v43 = vadd.f32 %v1669_v42, %v2378_v8  ;;  %v1703_v8 = vld [vmem:[%s2588_s10 + $0x10] sm:$0xff] }
 0xc26   : > { %v2186_v53 = vpack.c.bf16 %v1704_v52, %v1703_v8 }
 0xc27   : > { %v1671_v44 = vsel %vm548_vm1, %v1670_v43, 0.0 }
 0xc28   : > { %1672 = vadd.xlane.f32.xlu1 %v1671_v44  ;;  %2187 = vmatpush3.bf16.msra.mxu0 %v2186_v53 }
 0xcb5   : > { %v1673_v45 = vpop.xlane.xlu1 %1672 }
 0xcb6   : > { %v1675_v46 = vmul.f32 0.03125, %v1673_v45 }
 0xcb8   : > { %v1676_v47 = vsub.f32 %v1670_v43, %v1675_v46 }
 0xcba   : > { %v1677_v48 = vmul.f32 %v1676_v47, %v1676_v47 }
 0xcbc   : > { %v1678_v49 = vsel %vm548_vm1, %v1677_v48, 0.0 }
 0xcbd   : > { %1679 = vadd.xlane.f32.xlu1 %v1678_v49 }
 0xd4a   : > { %v1680_v63 = vpop.xlane.xlu1 %1679 }
 0xd4b   : > { %v1681_v0 = vmul.f32 0.03125, %v1680_v63 }
 0xd4d   : > { %v1682_v1 = vadd.f32 1e-05, %v1681_v0 }
 0xd4f   : > { %2234 = vrsqrt.f32 %v1682_v1 }
 0xd59   : > { %v2235_v2 = vpop.eup %2234 }
 0xd5a   : > { %v1684_v5 = vmul.f32 %v2235_v2, %v1676_v47 }
 0xd5c   : > { %v1692_v9 = vmul.f32 %v2000_v4, %v1684_v5 }
 0xd5e   : > { %v1700_v10 = vadd.f32 %v2001_v7, %v1692_v9 }
 0xd60   : > { %2149 = vmatmul.mubr.msk.f32.vlgmr.msra.gmra.mrb[16].mxu0 %vm548_vm1, %v1700_v10 }
 0xe33   : > { %v1781_v15 = vpop.f32.mrb[16].mxu0 }
 0xe34   : > { %v1782_v16 = vadd.f32 %v2002_v14, %v1781_v15  ;;  %v2150_v17 = vpop.f32.mrb[17].mxu0 }
 0xe36   : > { %v1785_v13 = vmax.f32 %v1782_v16, 0.0 }
 0xe38   : > { %2168 = vmatmul.mubr.msk.f32.vlgmr.msra.gmra.mrb[12].mxu1 %vm1801_vm3, %v1785_v13 }
 0xf0b   : > { %v1871_v19 = vpop.f32.mrb[12].mxu1 }
 0xf0c   : > { %v1872_v20 = vadd.f32 %v2004_v18, %v1871_v19  ;;  %v2169_v21 = vpop.f32.mrb[13].mxu1 }
 0xf0e   : > { %v1875_v22 = vadd.f32 %v1872_v20, %v1700_v10 }
 0xf10   : > { %v1876_v23 = vsel %vm548_vm1, %v1875_v22, 0.0 }
 0xf11   : > { %1877 = vadd.xlane.f32.xlu0 %v1876_v23 }
 0xf9e   : > { %v1878_v24 = vpop.xlane.xlu0 %1877 }
 0xf9f   : > { %v1879_v25 = vmul.f32 0.03125, %v1878_v24 }
 0xfa1   : > { %v1880_v26 = vsub.f32 %v1875_v22, %v1879_v25 }
 0xfa3   : > { %v1881_v27 = vmul.f32 %v1880_v26, %v1880_v26 }
 0xfa5   : > { %v1882_v28 = vsel %vm548_vm1, %v1881_v27, 0.0 }
 0xfa6   : > { %1883 = vadd.xlane.f32.xlu1 %v1882_v28 }
0x1033   : > { %v1884_v29 = vpop.xlane.xlu1 %1883 }
0x1034   : > { %v1885_v30 = vmul.f32 0.03125, %v1884_v29 }
0x1036   : > { %v1886_v31 = vadd.f32 1e-05, %v1885_v30 }
0x1038   : > { %2236 = vrsqrt.f32 %v1886_v31 }
0x1042   : > { %v2237_v32 = vpop.eup %2236 }
0x1043   : > { %v1888_v34 = vmul.f32 %v2237_v32, %v1880_v26 }
0x1045   : > { %v1896_v36 = vmul.f32 %v2006_v33, %v1888_v34 }
0x1047   : > { %v1904_v37 = vadd.f32 %v2007_v35, %v1896_v36 }
0x1049   : > { %1905 = vst.msk [vmem:[%s533_s27] sm:$0xff] %vm548_vm1, %v1904_v37 }
0x104a PF: > { %s26_s21 = sadd.s32 1, %s2244_s21  }
0x104b   : > { %p23_p4 = scmp.ge.s32.totalorder %s26_s21, 4  }
0x104d   :  { %25 = sbr.rel (!%p23_p4) target bundleno = 2 (0x2), region = 117 }

</bundles_post_ra>
